<compile_context>
chip_gen: v7x
topology: tpu7x:2x2x1
jax: 0.10.0
libtpu: 0.0.40
codegen_flags: <defaults>
</compile_context>

<pallas_src>
import numpy as np
import jax
import jax.numpy as jnp
from jax.experimental import pallas as pl
from jax.experimental.pallas import tpu as pltpu

N_VIEWS = 5
HID3 = 1500                      # hardcoded third encoder width in the reference module
N_Z = 10
N_CLUSTERS = 6
BATCH = 8
N_INPUT = [40, 60, 48, 64, 32]   # small per-view feature sizes

# padded (sublane/lane friendly) dims used inside the kernel
DIN = 64        # max(N_INPUT) padded
DH = 64         # max(round(0.8*n_in)) = 51, padded
DH3 = 1536      # 1500 padded to a multiple of 128
DZ = 128        # lane-dense per-view z width; view v's real z sits in lanes [16v, 16v+10)
Z_STRIDE = 16


def idec_kernel(x_ref, w12_ref, w3_ref, wz_ref, b_ref, vz_ref):
    v = pl.program_id(0)

    x = x_ref[v]              # (BP, DIN)      f32, resident slab indexed by view
    w12 = w12_ref[v]          # (DIN, 2*DH)    f32, W1 in lanes 0:DH, W2 in lanes DH:2DH
    w3 = w3_ref[0]            # (DH, DH3)      bf16, streamed per view
    wz = wz_ref[...]          # (DH3, DZ)      bf16, resident, all views packed in lanes
    b = b_ref[v]              # (8, DH3)       f32, rows 0..3 = b1, b2, b3, bz

    b1 = b[0:1, 0:DH]
    b2 = b[1:2, 0:DH]
    b3 = b[2:3, :]
    bz = b[3:4, 0:DZ]         # view v's bz already placed at lanes 16v..16v+10

    # per-view encoder chain; all slabs are zero-padded so pad rows/lanes are inert
    h = jnp.maximum(
        jnp.dot(x, w12[:, 0:DH], preferred_element_type=jnp.float32) + b1, 0.0)
    h = jnp.maximum(
        jnp.dot(h, w12[:, DH:2 * DH], preferred_element_type=jnp.float32) + b2, 0.0)
    h = jnp.maximum(
        jnp.dot(h.astype(jnp.bfloat16), w3, preferred_element_type=jnp.float32) + b3, 0.0)
    zv = jnp.dot(h.astype(jnp.bfloat16), wz, preferred_element_type=jnp.float32) + bz

    # lane-dense store; the wrapper extracts lanes [16v, 16v+10)
    vz_ref[0] = zv


def pack_params(params):
    """Pack per-view (W, b) lists into zero-padded, lane-dense slabs (done once)."""
    w12s = np.zeros((N_VIEWS, DIN, 2 * DH), np.float32)
    w3s = np.zeros((N_VIEWS, DH, DH3), np.float32)
    wzp = np.zeros((DH3, DZ), np.float32)           # all views packed into one slab
    bs = np.zeros((N_VIEWS, 8, DH3), np.float32)    # rows 0..3 = b1, b2, b3, bz
    for v in range(N_VIEWS):
        w1, b1, w2, b2, w3, b3, wz, bz = [np.asarray(p) for p in params[v * 8:(v + 1) * 8]]
        ni = N_INPUT[v]
        d = int(round(ni * 0.8))
        w12s[v, :ni, :d] = w1
        w12s[v, :d, DH:DH + d] = w2
        w3s[v, :d, :HID3] = w3
        wzp[:HID3, Z_STRIDE * v:Z_STRIDE * v + N_Z] = wz
        bs[v, 0, :d] = b1[0]
        bs[v, 1, :d] = b2[0]
        bs[v, 2, :HID3] = b3[0]
        bs[v, 3, Z_STRIDE * v:Z_STRIDE * v + N_Z] = bz[0]
    return (jnp.asarray(w12s),                               # f32 (tiny)
            jnp.asarray(w3s).astype(jnp.bfloat16),           # bf16: dominant bytes
            jnp.asarray(wzp).astype(jnp.bfloat16),           # bf16, resident
            jnp.asarray(bs))                                 # f32 (tiny)


@jax.jit
def idec_forward(xs, we, cluster_layer, ypred, sp_weight_sub, packed):
    w12s, w3s, wzp, bs = packed
    B = xs[0].shape[0]
    BP = ((B + 7) // 8) * 8

    # pack the 5 view inputs into one padded slab (fused under jit with the call)
    x_slab = jnp.zeros((N_VIEWS, BP, DIN), jnp.float32)
    for v in range(N_VIEWS):
        x_slab = x_slab.at[v, :B, :N_INPUT[v]].set(xs[v])

    grid_spec = pltpu.PrefetchScalarGridSpec(
        num_scalar_prefetch=0,
        grid=(N_VIEWS,),
        in_specs=[
            pl.BlockSpec((N_VIEWS, BP, DIN), lambda v: (0, 0, 0)),      # x (resident)
            pl.BlockSpec((N_VIEWS, DIN, 2 * DH), lambda v: (0, 0, 0)),  # W1|W2 (resident)
            pl.BlockSpec((1, DH, DH3), lambda v: (v, 0, 0)),            # W3 (streamed/view)
            pl.BlockSpec((DH3, DZ), lambda v: (0, 0)),                  # packed WZ (resident)
            pl.BlockSpec((N_VIEWS, 8, DH3), lambda v: (0, 0, 0)),       # biases (resident)
        ],
        out_specs=pl.BlockSpec((1, BP, DZ), lambda v: (v, 0, 0)),       # per-view z slab
    )

    vz_slab = pl.pallas_call(
        idec_kernel,
        out_shape=jax.ShapeDtypeStruct((N_VIEWS, BP, DZ), jnp.float32),
        grid_spec=grid_spec,
        compiler_params=pltpu.CompilerParams(
            dimension_semantics=("parallel",)),   # no cross-step state -> v7x can split views
    )(x_slab, w12s, w3s, wzp, bs)

    # tiny fusion + kl epilogue in plain JAX (fused under jit; frees the view axis)
    vzs = [vz_slab[v, :B, Z_STRIDE * v:Z_STRIDE * v + N_Z] for v in range(N_VIEWS)]
    summ = sum(we[:, v:v + 1] * vzs[v] for v in range(N_VIEWS))
    z = summ / jnp.sum(we, axis=1, keepdims=True)
    c = cluster_layer[ypred]                      # glue: gather in plain JAX
    sp = sp_weight_sub.reshape(-1, 1)
    kl = jnp.mean(sp * (z - c) ** 2) * B / jnp.sum(sp_weight_sub)
    return z, kl, vzs


def reference_forward(xs, we, cluster_layer, ypred, sp_weight_sub, params):
    zs = []
    for v in range(N_VIEWS):
        w1, b1, w2, b2, w3, b3, wz, bz = params[v * 8:(v + 1) * 8]
        h = jax.nn.relu(xs[v] @ w1 + b1)
        h = jax.nn.relu(h @ w2 + b2)
        h = jax.nn.relu(h @ w3 + b3)
        zs.append(h @ wz + bz)
    summ = sum(we[:, v:v + 1] * zs[v] for v in range(N_VIEWS))
    z = summ / jnp.sum(we, axis=1, keepdims=True)
    c = cluster_layer[ypred]
    sp = sp_weight_sub.reshape(-1, 1)
    kl = jnp.mean(sp * (z - c) ** 2) * z.shape[0] / jnp.sum(sp_weight_sub)
    return z, kl, zs


def make_params(key):
    """Deterministic xavier-uniform-like weights, zero biases (as in pretrain_ae)."""
    params = []
    for v in range(N_VIEWS):
        d = int(round(N_INPUT[v] * 0.8))
        layer_dims = [(N_INPUT[v], d), (d, d), (d, HID3), (HID3, N_Z)]
        for (fi, fo) in layer_dims:
            key, sub = jax.random.split(key)
            limit = float(np.sqrt(6.0 / (fi + fo)))
            w = jax.random.uniform(sub, (fi, fo), jnp.float32, -limit, limit)
            b = jnp.zeros((1, fo), jnp.float32)
            params += [w, b]
    return key, params


if __name__ == "__main__":
    key = jax.random.PRNGKey(0)
    key, params = make_params(key)
    packed = pack_params(params)

    keys = jax.random.split(key, 10)
    xs = [jax.random.normal(keys[v], (BATCH, N_INPUT[v]), jnp.float32)
          for v in range(N_VIEWS)]
    # binary view-availability mask; guarantee each sample has >=1 observed view
    we = (jax.random.uniform(keys[5], (BATCH, N_VIEWS)) > 0.3).astype(jnp.float32)
    we = we.at[:, 0].set(1.0)
    cluster_layer = jax.random.normal(keys[6], (N_CLUSTERS, N_Z), jnp.float32)
    ypred = jax.random.randint(keys[7], (BATCH,), 0, N_CLUSTERS)
    sp_weight_sub = jax.random.uniform(keys[8], (BATCH,), jnp.float32, 0.1, 1.0)

    z, kl, vzs = idec_forward(tuple(xs), we, cluster_layer, ypred, sp_weight_sub, packed)
    jax.block_until_ready(z)
    jax.block_until_ready(kl)
    for vz in vzs:
        jax.block_until_ready(vz)

    # correctness check against a plain-JAX f32 reference
    # (W3/WZ are stored in bf16 in the kernel path, so tolerances are relaxed)
    z_ref, kl_ref, vz_ref = reference_forward(
        xs, we, cluster_layer, ypred, sp_weight_sub, params)
    np.testing.assert_allclose(np.asarray(z), np.asarray(z_ref), rtol=5e-2, atol=5e-2)
    np.testing.assert_allclose(np.asarray(kl), np.asarray(kl_ref), rtol=5e-2, atol=5e-2)
    for a, b in zip(vzs, vz_ref):
        np.testing.assert_allclose(np.asarray(a), np.asarray(b), rtol=5e-2, atol=5e-2)

    print("KERNEL_OK")
</pallas_src>

<mosaic_0001>
module attributes {stable_mosaic.version = 11 : i64} {
  func.func @idec_kernel(%arg0: i32, %arg1: memref<5x8x64xf32, #tpu.memory_space<vmem>>, %arg2: memref<5x64x128xf32, #tpu.memory_space<vmem>>, %arg3: memref<1x64x1536xbf16, #tpu.memory_space<vmem>>, %arg4: memref<1536x128xbf16, #tpu.memory_space<vmem>>, %arg5: memref<5x8x1536xf32, #tpu.memory_space<vmem>>, %arg6: memref<1x8x128xf32, #tpu.memory_space<vmem>>) attributes {dimension_semantics = [#tpu.dimension_semantics<parallel>], iteration_bounds = array<i64: 5>, scalar_prefetch = 0 : i64, scratch_operands = 0 : i64, tpu.core_type = #tpu.core_type<tc>, window_params = [{pipeline_mode = #tpu.pipeline_mode<synchronous>, transform_indices = @transform_0, window_bounds = array<i64: 5, 8, 64>}, {pipeline_mode = #tpu.pipeline_mode<synchronous>, transform_indices = @transform_1, window_bounds = array<i64: 5, 64, 128>}, {transform_indices = @transform_2, window_bounds = array<i64: 1, 64, 1536>}, {pipeline_mode = #tpu.pipeline_mode<synchronous>, transform_indices = @transform_3, window_bounds = array<i64: 1536, 128>}, {pipeline_mode = #tpu.pipeline_mode<synchronous>, transform_indices = @transform_4, window_bounds = array<i64: 5, 8, 1536>}, {transform_indices = @transform_5, window_bounds = array<i64: 1, 8, 128>}]} {
    %0 = arith.index_cast %arg0 : i32 to index
    %c0 = arith.constant 0 : index
    %c0_0 = arith.constant 0 : index
    %1 = vector.load %arg1[%0, %c0, %c0_0] : memref<5x8x64xf32, #tpu.memory_space<vmem>>, vector<1x8x64xf32>
    %2 = vector.shape_cast %1 : vector<1x8x64xf32> to vector<8x64xf32>
    %3 = arith.index_cast %arg0 : i32 to index
    %c0_1 = arith.constant 0 : index
    %c0_2 = arith.constant 0 : index
    %4 = vector.load %arg2[%3, %c0_1, %c0_2] : memref<5x64x128xf32, #tpu.memory_space<vmem>>, vector<1x64x128xf32>
    %5 = vector.shape_cast %4 : vector<1x64x128xf32> to vector<64x128xf32>
    %c0_3 = arith.constant 0 : index
    %c0_4 = arith.constant 0 : index
    %c0_5 = arith.constant 0 : index
    %6 = vector.load %arg3[%c0_3, %c0_4, %c0_5] : memref<1x64x1536xbf16, #tpu.memory_space<vmem>>, vector<1x64x1536xbf16>
    %7 = vector.shape_cast %6 : vector<1x64x1536xbf16> to vector<64x1536xbf16>
    %c0_6 = arith.constant 0 : index
    %c0_7 = arith.constant 0 : index
    %8 = vector.load %arg4[%c0_6, %c0_7] : memref<1536x128xbf16, #tpu.memory_space<vmem>>, vector<1536x128xbf16>
    %9 = arith.index_cast %arg0 : i32 to index
    %c0_8 = arith.constant 0 : index
    %c0_9 = arith.constant 0 : index
    %10 = vector.load %arg5[%9, %c0_8, %c0_9] : memref<5x8x1536xf32, #tpu.memory_space<vmem>>, vector<1x8x1536xf32>
    %11 = vector.shape_cast %10 : vector<1x8x1536xf32> to vector<8x1536xf32>
    %12 = vector.extract_strided_slice %11 {offsets = [0, 0], sizes = [1, 64], strides = [1, 1]} : vector<8x1536xf32> to vector<1x64xf32>
    %13 = vector.extract_strided_slice %11 {offsets = [1, 0], sizes = [1, 64], strides = [1, 1]} : vector<8x1536xf32> to vector<1x64xf32>
    %14 = vector.extract_strided_slice %11 {offsets = [2, 0], sizes = [1, 1536], strides = [1, 1]} : vector<8x1536xf32> to vector<1x1536xf32>
    %15 = vector.extract_strided_slice %11 {offsets = [3, 0], sizes = [1, 128], strides = [1, 1]} : vector<8x1536xf32> to vector<1x128xf32>
    %16 = vector.extract_strided_slice %5 {offsets = [0, 0], sizes = [64, 64], strides = [1, 1]} : vector<64x128xf32> to vector<64x64xf32>
    %cst = arith.constant dense<0.000000e+00> : vector<8x64xf32>
    %17 = tpu.matmul %2, %16, %cst {dimension_numbers = #tpu.dot_dimension_numbers<[1], [0], [0], [1], [0, 0, 1, 1], [], []>} : vector<8x64xf32>, vector<64x64xf32>, vector<8x64xf32> -> vector<8x64xf32>
    %18 = vector.broadcast %12 : vector<1x64xf32> to vector<8x64xf32>
    %19 = arith.addf %17, %18 : vector<8x64xf32>
    %cst_10 = arith.constant 0.000000e+00 : f32
    %20 = vector.broadcast %cst_10 : f32 to vector<8x64xf32>
    %21 = arith.maximumf %19, %20 : vector<8x64xf32>
    %22 = vector.extract_strided_slice %5 {offsets = [0, 64], sizes = [64, 64], strides = [1, 1]} : vector<64x128xf32> to vector<64x64xf32>
    %cst_11 = arith.constant dense<0.000000e+00> : vector<8x64xf32>
    %23 = tpu.matmul %21, %22, %cst_11 {dimension_numbers = #tpu.dot_dimension_numbers<[1], [0], [0], [1], [0, 0, 1, 1], [], []>} : vector<8x64xf32>, vector<64x64xf32>, vector<8x64xf32> -> vector<8x64xf32>
    %24 = vector.broadcast %13 : vector<1x64xf32> to vector<8x64xf32>
    %25 = arith.addf %23, %24 : vector<8x64xf32>
    %cst_12 = arith.constant 0.000000e+00 : f32
    %26 = vector.broadcast %cst_12 : f32 to vector<8x64xf32>
    %27 = arith.maximumf %25, %26 : vector<8x64xf32>
    %28 = arith.truncf %27 : vector<8x64xf32> to vector<8x64xbf16>
    %cst_13 = arith.constant dense<0.000000e+00> : vector<8x1536xf32>
    %29 = tpu.matmul %28, %7, %cst_13 {dimension_numbers = #tpu.dot_dimension_numbers<[1], [0], [0], [1], [0, 0, 1, 1], [], []>} : vector<8x64xbf16>, vector<64x1536xbf16>, vector<8x1536xf32> -> vector<8x1536xf32>
    %30 = vector.broadcast %14 : vector<1x1536xf32> to vector<8x1536xf32>
    %31 = arith.addf %29, %30 : vector<8x1536xf32>
    %cst_14 = arith.constant 0.000000e+00 : f32
    %32 = vector.broadcast %cst_14 : f32 to vector<8x1536xf32>
    %33 = arith.maximumf %31, %32 : vector<8x1536xf32>
    %34 = arith.truncf %33 : vector<8x1536xf32> to vector<8x1536xbf16>
    %cst_15 = arith.constant dense<0.000000e+00> : vector<8x128xf32>
    %35 = tpu.matmul %34, %8, %cst_15 {dimension_numbers = #tpu.dot_dimension_numbers<[1], [0], [0], [1], [0, 0, 1, 1], [], []>} : vector<8x1536xbf16>, vector<1536x128xbf16>, vector<8x128xf32> -> vector<8x128xf32>
    %36 = vector.broadcast %15 : vector<1x128xf32> to vector<8x128xf32>
    %37 = arith.addf %35, %36 : vector<8x128xf32>
    %c0_16 = arith.constant 0 : index
    %c0_17 = arith.constant 0 : index
    %c0_18 = arith.constant 0 : index
    %38 = vector.load %arg6[%c0_16, %c0_17, %c0_18] : memref<1x8x128xf32, #tpu.memory_space<vmem>>, vector<1x8x128xf32>
    %39 = vector.shape_cast %38 : vector<1x8x128xf32> to vector<8x128xf32>
    %40 = vector.shape_cast %37 : vector<8x128xf32> to vector<1x8x128xf32>
    tpu.vector_store %arg6[%c0_16, %c0_17, %c0_18], %40 {strides = array<i32>} : memref<1x8x128xf32, #tpu.memory_space<vmem>>, vector<1x8x128xf32>,
    return
  }
  func.func @transform_0(%arg0: i32) -> (i32, i32, i32) {
    %c0_i32 = arith.constant 0 : i32
    %c0_i32_0 = arith.constant 0 : i32
    %c0_i32_1 = arith.constant 0 : i32
    %c0_i32_2 = arith.constant 0 : i32
    return %c0_i32, %c0_i32_0, %c0_i32_1 : i32, i32, i32
  }
  func.func @transform_1(%arg0: i32) -> (i32, i32, i32) {
    %c0_i32 = arith.constant 0 : i32
    %c0_i32_0 = arith.constant 0 : i32
    %c0_i32_1 = arith.constant 0 : i32
    %c0_i32_2 = arith.constant 0 : i32
    return %c0_i32, %c0_i32_0, %c0_i32_1 : i32, i32, i32
  }
  func.func @transform_2(%arg0: i32) -> (i32, i32, i32) {
    %c0_i32 = arith.constant 0 : i32
    %c0_i32_0 = arith.constant 0 : i32
    %c0_i32_1 = arith.constant 0 : i32
    return %arg0, %c0_i32, %c0_i32_0 : i32, i32, i32
  }
  func.func @transform_3(%arg0: i32) -> (i32, i32) {
    %c0_i32 = arith.constant 0 : i32
    %c0_i32_0 = arith.constant 0 : i32
    %c0_i32_1 = arith.constant 0 : i32
    return %c0_i32, %c0_i32_0 : i32, i32
  }
  func.func @transform_4(%arg0: i32) -> (i32, i32, i32) {
    %c0_i32 = arith.constant 0 : i32
    %c0_i32_0 = arith.constant 0 : i32
    %c0_i32_1 = arith.constant 0 : i32
    %c0_i32_2 = arith.constant 0 : i32
    return %c0_i32, %c0_i32_0, %c0_i32_1 : i32, i32, i32
  }
  func.func @transform_5(%arg0: i32) -> (i32, i32, i32) {
    %c0_i32 = arith.constant 0 : i32
    %c0_i32_0 = arith.constant 0 : i32
    %c0_i32_1 = arith.constant 0 : i32
    return %arg0, %c0_i32, %c0_i32_0 : i32, i32, i32
  }
}

</mosaic_0001>

<bundles_post_ra>
// kernel: idec_forward.1
= control target key start
LH: loop header
LB: loop body
LE: loop exit
PB: predicated region body
PF: predicated region fallthrough
CT: control target
= control target key end

     0   :  { %s3417_s0 = inlined_call_operand.vmem [shape: f32[5,8,64], index: 0, kind: input, shape index: {}]   ;;  %s3418_s1 = inlined_call_operand.hbm [shape: f32[5,64,128], index: 1, kind: input, shape index: {}]   ;;  %s3419_s2 = inlined_call_operand.hbm [shape: bf16[5,64,1536], index: 2, kind: input, shape index: {}]   ;;  %s3420_s3 = inlined_call_operand.hbm [shape: bf16[1536,128], index: 3, kind: input, shape index: {}]   ;;  %s3421_s4 = inlined_call_operand.hbm [shape: f32[5,8,1536], index: 4, kind: input, shape index: {}]   ;;  %s3422_s5 = inlined_call_operand.vmem [shape: f32[5,8,128], index: 5, kind: output, shape index: {}]  }
   0x1   :  { %3427 = sst [smem:[#allocation13_spill]] %s3420_s3 }
   0x2   :  { %10 = vsyncpa [#allocation3], 0 }
   0x3   :  { %11 = vsyncpa [#allocation5], 0 }
   0x4   :  { %13 = vsyncpa [#allocation5 + $0x1], 0 }
   0x5   :  { %14 = vsyncpa [#allocation8], 0  ;;  %s3095_s18 = smov 0   ;;  %s3097_s19 = smov 0  }
   0x6   :  { %s3099_s20 = smov 0   ;;  %s3101_s21 = smov 0  }
   0x7 LB: > { %s3114_s22 = sadd.s32 4294967295, %s3046_s21   ;;  %s3117_s23 = sadd.s32 1, %s3046_s21   ;;  %s3046_s21 = sphi %s3101_s21, %s3446_s21   ;;  %s3042_s20 = sphi %s3099_s20, %s3445_s20   ;;  %s3038_s19 = sphi %s3097_s19, %s3444_s19   ;;  %s3034_s18 = sphi %s3095_s18, %s3443_s18  }
   0x8   : > { %s66_s24 = ssub.s32 %s3046_s21, %s3117_s23  ;;  %s69_s25 = sadd.s32 1, %s3042_s20 }
   0x9   : > { %p67_p0 = scmp.eq.s32.totalorder %s66_s24, 0  ;;  %p76_p1 = scmp.ne.s32.totalorder %s3042_s20, %s3038_s19 }
   0xa   : > { %p77_p2 = scmp.eq.s32.totalorder %s3046_s21, 0  ;;  %p82_p3 = scmp.ne.s32.totalorder %s3038_s19, %s3034_s18 }
   0xb   : > { %s3127_s26 = scalar_select %p67_p0, %s3042_s20, %s69_s25  }
   0xc   : > { %p78_p4 = por %p77_p2, %p76_p1  ;;  %p3423_p5 = scmp.eq.s32.totalorder %s3114_s22, 0 }
   0xd   : > { %p2231_p6 = scmp.ge.s32.totalorder %s3046_s21, 1  ;;  %p161_p7 = scmp.lt.s32.totalorder %s3046_s21, 6 }
   0xe   : > { %p3134_p8 = por %p3423_p5, %p82_p3  ;;  %s3048_s29 = smov [#allocation6]  }
   0xf   : > { %p3138_p9 = pnand %p2231_p6, %p161_p7  ;;  %s189_s30 = sshll.u32 %s3048_s29, 4  ;;  %s190_s30 = int_to_ptr.vmem [resolvable:$true] %s189_s30 }
  0x10   : > { %s3428_s27 = scalar_select %p3134_p8, 1, 0 }
  0x11   : > { %s3429_s28 = scalar_select %p3138_p9, 1, 0 }
  0x12   : > { %p2629_p10 = pneg %p3138_p9  ;;  %p2646_p12 = scmp.lt.s32.totalorder %s3046_s21, 5 }
  0x13   : > { %s3432_s3 = sld [smem:[#allocation13_spill]] }
  0x14   : > { %p3146_p11 = pnand %p2629_p10, %p3423_p5  ;;  %p3151_p13 = pnand %p2646_p12, %p78_p4 }
  0x16   : > { %s3431_s7 = scalar_select %p3151_p13, 1, 0 }
  0x17   : > { %p3163_p1 = pneg %p3146_p11 }
  0x19   : > { %s2886_s10 = scalar_lea.hbm %s3432_s3, 12288 }
  0x1a   : > { %p2887_p0 = scmp.ne.s32.totalorder %s3432_s3, %s2886_s10  ;;  %p2893_p4 = scmp.lt.u32.totalorder %s2886_s10, %s3432_s3 }
  0x1c   : > { %p2889_p2 = pnand %p3163_p1, %p2887_p0 }
  0x1e   : > { %p2890_p3 = pneg %p2889_p2 }
  0x20   : > { %p2895_p6 = pnand %p2893_p4, %p2890_p3 }
  0x22   : > { %2898 = shalt.err (!%p2895_p6)
}
  0x23   : > { %s2899_s16 = scalar_lea.vmem %s190_s30, 12288  ;;  %p2907_p5 = scmp.lt.s32.totalorder %s190_s30, %s190_s30 }
  0x24   : > { %p2900_p7 = scmp.ne.s32.totalorder %s190_s30, %s2899_s16  ;;  %p2908_p8 = scmp.lt.s32.totalorder %s2899_s16, %s2899_s16 }
  0x26   : > { %p2902_p10 = pnand %p2900_p7, %p3163_p1  ;;  %p2909_p9 = por %p2908_p8, %p2907_p5 }
  0x28   : > { %p2903_p12 = pneg %p2902_p10 }
  0x2a   : > { %p2910_p13 = pnand %p2909_p9, %p2903_p12 }
  0x2c   : > { %2913 = shalt.err (!%p2910_p13)
}
  0x2d   : > { %s3049_s17 = smov 64   ;;  %s3050_s18 = smov 4  }
  0x2e   : > { %2635 = dma.hbm_to_vmem [thread:$0]  (!%p3146_p11), %s3432_s3, 12288, %s190_s30, [#allocation5], %s3049_s17, %s3049_s17, %s3050_s18  }
  0x2f   : > { %s3051_s29 = smov [#allocation2]   ;;  %s2914_s11 = scalar_lea.hbm %s3418_s1, 5120 }
  0x30   : > { %s176_s8 = sshll.u32 %s3051_s29, 4  ;;  %p2915_p5 = scmp.ne.s32.totalorder %s3418_s1, %s2914_s11  ;;  %s177_s8 = int_to_ptr.vmem [resolvable:$true] %s176_s8 }
  0x31   : > { %p2921_p13 = scmp.lt.u32.totalorder %s2914_s11, %s3418_s1 }
  0x32   : > { %p2917_p8 = pnand %p2915_p5, %p3163_p1 }
  0x34   : > { %p2918_p9 = pneg %p2917_p8 }
  0x36   : > { %p2923_p0 = pnand %p2921_p13, %p2918_p9 }
  0x38   : > { %2926 = shalt.err (!%p2923_p0)
}
  0x39   : > { %s2927_s30 = scalar_lea.vmem %s177_s8, 5120  ;;  %p2935_p6 = scmp.lt.s32.totalorder %s177_s8, %s177_s8 }
  0x3a   : > { %p2928_p2 = scmp.ne.s32.totalorder %s177_s8, %s2927_s30  ;;  %p2936_p7 = scmp.lt.s32.totalorder %s2927_s30, %s2927_s30 }
  0x3c   : > { %p2930_p3 = pnand %p2928_p2, %p3163_p1  ;;  %p2937_p10 = por %p2936_p7, %p2935_p6 }
  0x3e   : > { %p2931_p4 = pneg %p2930_p3 }
  0x40   : > { %p2938_p12 = pnand %p2937_p10, %p2931_p4 }
  0x42   : > { %2941 = shalt.err (!%p2938_p12)
}
  0x43   : > { %s3052_s17 = smov 128   ;;  %s3053_s18 = smov 8  }
  0x44   : > { %2632 = dma.hbm_to_vmem [thread:$0]  (!%p3146_p11), %s3418_s1, 5120, %s177_s8, [#allocation3], %s3052_s17, %s3052_s17, %s3053_s18  }
  0x45   : > { %s3054_s29 = smov [#allocation7]   ;;  %s216_s10 = sand.u32 1, %s3046_s21  }
  0x46   : > { %s202_s9 = sshll.u32 %s3054_s29, 4  ;;  %s2942_s14 = scalar_lea.hbm %s3421_s4, 7680  ;;  %s203_s9 = int_to_ptr.vmem [resolvable:$true] %s202_s9 }
  0x47   : > { %p2943_p5 = scmp.ne.s32.totalorder %s3421_s4, %s2942_s14  ;;  %p2949_p13 = scmp.lt.u32.totalorder %s2942_s14, %s3421_s4 }
  0x49   : > { %p2945_p8 = pnand %p2943_p5, %p3163_p1 }
  0x4b   : > { %p2946_p9 = pneg %p2945_p8 }
  0x4d   : > { %p2951_p0 = pnand %p2949_p13, %p2946_p9 }
  0x4f   : > { %2954 = shalt.err (!%p2951_p0)
}
  0x50   : > { %s2955_s8 = scalar_lea.vmem %s203_s9, 7680  ;;  %p2963_p6 = scmp.lt.s32.totalorder %s203_s9, %s203_s9 }
  0x51   : > { %p2956_p2 = scmp.ne.s32.totalorder %s203_s9, %s2955_s8  ;;  %p2964_p7 = scmp.lt.s32.totalorder %s2955_s8, %s2955_s8 }
  0x53   : > { %p2958_p3 = pnand %p2956_p2, %p3163_p1  ;;  %p2965_p10 = por %p2964_p7, %p2963_p6 }
  0x55   : > { %p2959_p4 = pneg %p2958_p3 }
  0x57   : > { %p2966_p12 = pnand %p2965_p10, %p2959_p4 }
  0x59   : > { %2969 = shalt.err (!%p2966_p12)
}
  0x5a   : > { %s3055_s17 = smov 1536   ;;  %s3056_s3 = smov 96  }
  0x5b   : > { %2638 = dma.hbm_to_vmem [thread:$0]  (!%p3146_p11), %s3421_s4, 7680, %s203_s9, [#allocation8], %s3055_s17, %s3055_s17, %s3056_s3  }
  0x5c   : > { %s218_s13 = sand.u32 1, %s3042_s20   ;;  %s2613_s29 = smul.u32 6144, %s3046_s21 }
  0x5d   : > { %s2612_s25 = smul.u32 384, %s218_s13  ;;  %s3225_s6 = scalar_lea.sflag [#allocation5], %s216_s10 }
  0x5e   : > { %s3221_s14 = scalar_lea.hbm %s3419_s2, %s2613_s29  ;;  %p3434_p1 = scmp.ne.s32.totalorder %s3431_s7, 0 }
  0x5f   : > { %s220_s15 = scalar_lea.vmem [#allocation4], %s2612_s25  ;;  %s2970_s30 = scalar_lea.hbm %s3221_s14, 6144 }
  0x60   : > { %s227_s16 = sshll.u32 %s220_s15, 4  ;;  %p2971_p11 = scmp.ne.s32.totalorder %s3221_s14, %s2970_s30  ;;  %s3223_s16 = int_to_ptr.vmem [resolvable:$true] %s227_s16 }
  0x61   : > { %p2972_p5 = pneg %p3434_p1  ;;  %s2975_s8 = scalar_lea.hbm %s3419_s2, 30720 }
  0x62   : > { %p2976_p13 = scmp.lt.u32.totalorder %s3221_s14, %s3419_s2  ;;  %p2977_p0 = scmp.lt.u32.totalorder %s2975_s8, %s2970_s30 }
  0x63   : > { %p2973_p8 = pnand %p2972_p5, %p2971_p11  ;;  %p2979_p3 = scmp.lt.u32.totalorder %s2970_s30, %s3221_s14 }
  0x64   : > { %p2978_p2 = por %p2977_p0, %p2976_p13 }
  0x65   : > { %p2974_p9 = pneg %p2973_p8 }
  0x66   : > { %p2980_p4 = por %p2979_p3, %p2978_p2 }
  0x68   : > { %p2981_p6 = pnand %p2980_p4, %p2974_p9 }
  0x6a   : > { %2984 = shalt.err (!%p2981_p6)
}
  0x6b   : > { %s2985_s10 = scalar_lea.vmem %s3223_s16, 6144  ;;  %s3057_s18 = smov [#allocation4]  }
  0x6c   : > { %p2986_p7 = scmp.ne.s32.totalorder %s3223_s16, %s2985_s10  ;;  %s2990_s24 = sshll.u32 %s3057_s18, 4  ;;  %s2991_s24 = int_to_ptr.vmem [resolvable:$false] %s2990_s24 }
  0x6d   : > { %s2992_s13 = scalar_lea.vmem %s2991_s24, 12288  ;;  %p2993_p11 = scmp.lt.s32.totalorder %s3223_s16, %s2991_s24 }
  0x6e   : > { %p2988_p10 = pnand %p2986_p7, %p2972_p5  ;;  %p2994_p8 = scmp.lt.s32.totalorder %s2992_s13, %s2985_s10 }
  0x70   : > { %p2989_p12 = pneg %p2988_p10  ;;  %p2995_p13 = por %p2994_p8, %p2993_p11 }
  0x72   : > { %p2996_p0 = pnand %p2995_p13, %p2989_p12 }
  0x74   : > { %2999 = shalt.err (!%p2996_p0)
}
  0x75   : > { %s3058_s25 = smov 768   ;;  %s3059_s29 = smov 48  }
  0x76   : > { %2642 = dma.hbm_to_vmem [thread:$0]  (!%p3434_p1), %s3221_s14, 6144, %s3223_s16, %s3225_s6, %s3058_s25, %s3058_s25, %s3059_s29  }
  0x77   : > { %p3435_p5 = scmp.ne.s32.totalorder %s3429_s28, 0 }
  0x78   : > { %p3436_p9 = scmp.eq.s32.totalorder (!%p3435_p5), %s3114_s22, 0 }
  0x79   : > { %239 = sbr.rel (%p3435_p5) target bundleno = 1098 (0x44a), region = 40 }
  0x80   : > { %3017 = dma.done.wait (%p3436_p9), [#allocation3], 5120   ;;  %p3437_p2 = pmov %p3436_p9 }
  0x81   : > { %s245_s11 = sand.u32 1, %s3114_s22   ;;  %s247_s12 = sand.u32 1, %s3038_s19  }
  0x82   : > { %3019 = vsyncadd (%p3437_p2), [#allocation3], 4294962176  ;;  %s2614_s15 = smul.u32 384, %s247_s12  ;;  %s246_s30 = scalar_lea.sflag [#allocation5], %s245_s11 }
  0x83   : > { %p3438_p3 = scmp.ne.s32.totalorder %s3428_s27, 0 }
  0x84   : > { %s3261_s21 = scalar_lea.vmem [#allocation4], %s2614_s15 }
  0x85   : > { %3021 = dma.done.wait (%p3438_p3), %s246_s30, 6144  }
  0x86   : > { %3023 = vsyncadd (%p3438_p3), %s246_s30, 4294961152  ;;  %p3439_p1 = pmov %p3437_p2 }
  0x88   : > { %3025 = dma.done.wait (%p3439_p1), [#allocation5], 12288   ;;  %p3440_p4 = pmov %p3439_p1 }
  0x89   : > { %p3441_p6 = pmov %p3439_p1 }
  0x8a   : > { %3027 = vsyncadd (%p3440_p4), [#allocation5], 4294955008 }
  0x8b   : > { %3029 = dma.done.wait (%p3441_p6), [#allocation8], 7680   ;;  %p3442_p7 = pmov %p3439_p1 }
  0x8c   : > { %v3060_v0 = vmov 0.0|0.0   ;;  %s2243_s28 = sshll.u32 %s3114_s22, 6  ;;  %vm3061_vm0 = vmmov 0   ;;  %v3062_v1 = vmov 0.0   ;;  %s3063_s7 = smov 64   ;;  %vm560_vm1 = vcmask 523264  }
  0x8d   : > { %3031 = vsyncadd (%p3442_p7), [#allocation8], 4294959616  ;;  %2588 = vmatprep.subr.bf16.mxu0 %v3060_v0  ;;  %2566 = vmatprep.mubr.msk.f32.mxu0 %vm3061_vm0, %v3062_v1  ;;  %s292_s27 = scalar_lea.vmem [#allocation2], %s2243_s28  ;;  %s2242_s14 = sshll.u32 %s3114_s22, 3  ;;  %v2718_v19 = vld [vmem:[%s3261_s21] ss:$48 sps:$4 sm:$0xff]   ;;  %v556_v42 = vlaneseq }
  0x8e   : > { %2600 = vmatprep.subr.bf16.mxu1 %v3060_v0  ;;  %2585 = vmatprep.mubr.msk.f32.mxu1 %vm3061_vm0, %v3062_v1  ;;  %v293_v2 = vld [vmem:[%s292_s27] sm:$0xff]  ;;  %v294_v3 = vld [vmem:[%s292_s27 + $0x8] sm:$0xff]  ;;  %v295_v4 = vld [vmem:[%s292_s27 + $0x10] sm:$0xff]  ;;  %s289_s9 = scalar_lea.vmem %s3417_s0, %s2242_s14  ;;  %s2399_s8 = smul.u32 96, %s3114_s22  ;;  %v3064_v62 = vmov 0  }
  0x8f   : > { %v2589_v5 = vpack.c.bf16 %v294_v3, %v293_v2  ;;  %v296_v6 = vld [vmem:[%s292_s27 + $0x18] sm:$0xff]  ;;  %v297_v7 = vld [vmem:[%s292_s27 + $0x20] sm:$0xff]  ;;  %v298_v8 = vld [vmem:[%s292_s27 + $0x28] sm:$0xff]  ;;  %v2698_v9 = vpack.i.bf16 %v294_v3, %v293_v2  ;;  %v3297_v43 = vshrl.u32 %v556_v42, 7  ;;  %p283_p10 = scmp.lt.s32.totalorder %s3114_s22, 4 }
  0x90   : > { %v299_v10 = vld [vmem:[%s292_s27 + $0x30] sm:$0xff]  ;;  %v300_v11 = vld [vmem:[%s292_s27 + $0x38] sm:$0xff]  ;;  %v2708_v12 = vpack.i.bf16 %v298_v8, %v297_v7  ;;  %v2592_v13 = vpack.c.bf16 %v296_v6, %v295_v4  ;;  %v2703_v14 = vpack.i.bf16 %v296_v6, %v295_v4  ;;  %v2595_v16 = vpack.c.bf16 %v298_v8, %v297_v7  ;;  %v290_v18 = vld [vmem:[%s289_s9] sm:$0xff]  ;;  %s3300_s17 = scalar_lea.vmem [#allocation7], %s2399_s8 }
  0x91   : > { %2590 = vmatpush3.bf16.msra.mxu0 %v2589_v5  ;;  %2699 = vrot.lane.b32.xlu0 %v2698_v9, %s3063_s7  ;;  %v2713_v15 = vpack.i.bf16 %v300_v11, %v299_v10  ;;  %v2598_v17 = vpack.c.bf16 %v300_v11, %v299_v10  ;;  %v2720_v20 = vld [vmem:[%s3261_s21 + $0x4] ss:$48 sps:$4 sm:$0xff]   ;;  %v2724_v22 = vld [vmem:[%s3261_s21 + $0x60] ss:$48 sps:$4 sm:$0xff]   ;;  %v2723_v41 = vld [vmem:[%s3261_s21 + $0xc] ss:$48 sps:$4 sm:$0xff]  }
  0x92   : > { %2591 = vmatprep.subr.bf16.mxu0 %v3060_v0  ;;  %2709 = vrot.lane.b32.xlu1 %v2708_v12, %s3063_s7  ;;  %v2726_v21 = vld [vmem:[%s3261_s21 + $0x64] ss:$48 sps:$4 sm:$0xff]   ;;  %v2730_v24 = vld [vmem:[%s3261_s21 + $0xc0] ss:$48 sps:$4 sm:$0xff]   ;;  %v558_v44 = vsub.s32 0, %v3297_v43  ;;  %v637_v63 = vsub.s32 1, %v3297_v43 }
  0x93   : > { %v2732_v23 = vld [vmem:[%s3261_s21 + $0xc4] ss:$48 sps:$4 sm:$0xff]   ;;  %v2721_v50 = vld [vmem:[%s3261_s21 + $0x8] ss:$48 sps:$4 sm:$0xff]   ;;  %v2729_v52 = vld [vmem:[%s3261_s21 + $0x6c] ss:$48 sps:$4 sm:$0xff]  }
  0x94   : > { %v3303_v45 = vld [vmem:[%s3300_s17] sm:$0xff]  ;;  %v2727_v53 = vld [vmem:[%s3261_s21 + $0x68] ss:$48 sps:$4 sm:$0xff]   ;;  %v2735_v54 = vld [vmem:[%s3261_s21 + $0xcc] ss:$48 sps:$4 sm:$0xff]   ;;  %s3448_s22 = smov (!%p283_p10, %s3114_s22), 4 }
  0x95   : > { %2593 = vmatpush3.bf16.msra.mxu0 %v2592_v13  ;;  %2704 = vrot.lane.b32.xlu0 %v2703_v14, %s3063_s7  ;;  %v559_v46 = vrot.slane %v3303_v45, %v558_v44  ;;  %v2733_v55 = vld [vmem:[%s3261_s21 + $0xc8] ss:$48 sps:$4 sm:$0xff]   ;;  %v2738_v56 = vld [vmem:[%s3261_s21 + $0x124] ss:$48 sps:$4 sm:$0xff]   ;;  %v2741_v57 = vld [vmem:[%s3261_s21 + $0x12c] ss:$48 sps:$4 sm:$0xff]  }
  0x96   : > { %2594 = vmatprep.subr.bf16.mxu0 %v3060_v0  ;;  %2714 = vrot.lane.b32.xlu1 %v2713_v15, %s3063_s7  ;;  %v2736_v58 = vld [vmem:[%s3261_s21 + $0x120] ss:$48 sps:$4 sm:$0xff]   ;;  %v2739_v59 = vld [vmem:[%s3261_s21 + $0x128] ss:$48 sps:$4 sm:$0xff]   ;;  %v2744_v60 = vld [vmem:[%s3261_s21 + $0x14] ss:$48 sps:$4 sm:$0xff]  }
  0x97   : > { %v2747_v61 = vld [vmem:[%s3261_s21 + $0x1c] ss:$48 sps:$4 sm:$0xff]   ;;  %v2742_v5 = vld [vmem:[%s3261_s21 + $0x10] ss:$48 sps:$4 sm:$0xff]   ;;  %v2745_v6 = vld [vmem:[%s3261_s21 + $0x18] ss:$48 sps:$4 sm:$0xff]  }
  0x98   : > { %v2750_v8 = vld [vmem:[%s3261_s21 + $0x74] ss:$48 sps:$4 sm:$0xff]   ;;  %v2753_v9 = vld [vmem:[%s3261_s21 + $0x7c] ss:$48 sps:$4 sm:$0xff]   ;;  %v2748_v10 = vld [vmem:[%s3261_s21 + $0x70] ss:$48 sps:$4 sm:$0xff]  }
  0x99   : > { %2596 = vmatpush3.bf16.msra.mxu0 %v2595_v16  ;;  %v2751_v11 = vld [vmem:[%s3261_s21 + $0x78] ss:$48 sps:$4 sm:$0xff]   ;;  %v2756_v12 = vld [vmem:[%s3261_s21 + $0xd4] ss:$48 sps:$4 sm:$0xff]   ;;  %v2759_v13 = vld [vmem:[%s3261_s21 + $0xdc] ss:$48 sps:$4 sm:$0xff]  }
  0x9a   : > { %2597 = vmatprep.subr.bf16.mxu0 %v3060_v0  ;;  %v2754_v14 = vld [vmem:[%s3261_s21 + $0xd0] ss:$48 sps:$4 sm:$0xff]   ;;  %v2757_v15 = vld [vmem:[%s3261_s21 + $0xd8] ss:$48 sps:$4 sm:$0xff]   ;;  %v2762_v16 = vld [vmem:[%s3261_s21 + $0x134] ss:$48 sps:$4 sm:$0xff]  }
  0x9b   : > { %v2796_v42 = vld [vmem:[#allocation6 + $0x8] sm:$0xff]   ;;  %s2241_s3 = sshll.u32 %s3448_s22, 3 }
  0x9c   : > { %v2797_v44 = vld [vmem:[#allocation6 + $0x88] sm:$0xff]   ;;  %s286_s24 = scalar_lea.vmem %s3422_s5, %s2241_s3 }
  0x9d   : > { %2599 = vmatpush3.bf16.msra.mxu0 %v2598_v17  ;;  %v2765_v17 = vld [vmem:[%s3261_s21 + $0x13c] ss:$48 sps:$4 sm:$0xff]  }
  0x9e   : > { %1037 = vmatprep.subr.bf16.mxu0 %v2720_v20  ;;  %v2768_v20 = vld [vmem:[%s3261_s21 + $0x24] ss:$48 sps:$4 sm:$0xff]  }
  0xa0   : > { %2567 = vmatmul.mubr.msk.f32.vlgmr.msra.gmra.mrb[0].mxu0 %vm560_vm1, %v290_v18  ;;  %v2760_v18 = vld [vmem:[%s3261_s21 + $0x130] ss:$48 sps:$4 sm:$0xff]  }
  0xa1   : > { %1038 = vmatpush1.bf16.msra.mxu0 %v2718_v19  ;;  %1069 = vmatprep.mubr.bf16.mxu0 %v3064_v62  ;;  %v2763_v19 = vld [vmem:[%s3261_s21 + $0x138] ss:$48 sps:$4 sm:$0xff]  }
  0xa2   : > { %1039 = vmatprep.subr.bf16.mxu0 %v2726_v21  ;;  %v2771_v21 = vld [vmem:[%s3261_s21 + $0x2c] ss:$48 sps:$4 sm:$0xff]  }
  0xa5   : > { %1040 = vmatpush1.bf16.msra.mxu0 %v2724_v22  ;;  %v2766_v22 = vld [vmem:[%s3261_s21 + $0x20] ss:$48 sps:$4 sm:$0xff]  }
  0xa6   : > { %1041 = vmatprep.subr.bf16.mxu0 %v2732_v23  ;;  %v2769_v23 = vld [vmem:[%s3261_s21 + $0x28] ss:$48 sps:$4 sm:$0xff]  }
  0xa9   : > { %1042 = vmatpush1.bf16.msra.mxu0 %v2730_v24  ;;  %v2774_v24 = vld [vmem:[%s3261_s21 + $0x84] ss:$48 sps:$4 sm:$0xff]  }
  0xaa   : > { %1043 = vmatprep.subr.bf16.mxu0 %v2738_v56  ;;  %v2808_v56 = vld [vmem:[#allocation6 + $0x20] sm:$0xff]  }
  0xad   : > { %1044 = vmatpush1.bf16.msra.mxu0 %v2736_v58  ;;  %v2810_v58 = vld [vmem:[#allocation6 + $0x68] sm:$0xff]  }
  0xae   : > { %1119 = vmatprep.subr.bf16.mxu0 %v2744_v60  ;;  %v2812_v60 = vld [vmem:[#allocation6 + $0x28] sm:$0xff]  }
 0x103   : > { %v2700_v25 = vpop.permute.xlu0 %2699 }
 0x104   : > { %v2702_v26 = vunpack.i.h.bf16 %v2700_v25  ;;  %v2701_v27 = vunpack.i.l.bf16 %v2700_v25  ;;  %v2710_v28 = vpop.permute.xlu1 %2709  ;;  %v2777_v25 = vld [vmem:[%s3261_s21 + $0x8c] ss:$48 sps:$4 sm:$0xff]  }
 0x105   : > { %v2712_v33 = vunpack.i.h.bf16 %v2710_v28  ;;  %v2711_v34 = vunpack.i.l.bf16 %v2710_v28  ;;  %v2780_v28 = vld [vmem:[%s3261_s21 + $0xe4] ss:$48 sps:$4 sm:$0xff]  }
 0x106   : > { %v2601_v29 = vpack.c.bf16 %v2702_v26, %v2701_v27  ;;  %v2772_v26 = vld [vmem:[%s3261_s21 + $0x80] ss:$48 sps:$4 sm:$0xff]   ;;  %v2775_v27 = vld [vmem:[%s3261_s21 + $0x88] ss:$48 sps:$4 sm:$0xff]  }
 0x107   : > { %v2705_v30 = vpop.permute.xlu0 %2704  ;;  %v2607_v37 = vpack.c.bf16 %v2712_v33, %v2711_v34  ;;  %v2789_v33 = vld [vmem:[%s3261_s21 + $0x14c] ss:$48 sps:$4 sm:$0xff]   ;;  %v2784_v34 = vld [vmem:[%s3261_s21 + $0x140] ss:$48 sps:$4 sm:$0xff]  }
 0x108   : > { %v2707_v31 = vunpack.i.h.bf16 %v2705_v30  ;;  %v2706_v32 = vunpack.i.l.bf16 %v2705_v30  ;;  %2602 = vmatpush3.bf16.msra.mxu1 %v2601_v29  ;;  %v2715_v35 = vpop.permute.xlu1 %2714  ;;  %v2783_v29 = vld [vmem:[%s3261_s21 + $0xec] ss:$48 sps:$4 sm:$0xff]   ;;  %v2778_v30 = vld [vmem:[%s3261_s21 + $0xe0] ss:$48 sps:$4 sm:$0xff]  }
 0x109   : > { %2603 = vmatprep.subr.bf16.mxu1 %v3060_v0  ;;  %v2717_v38 = vunpack.i.h.bf16 %v2715_v35  ;;  %v2716_v39 = vunpack.i.l.bf16 %v2715_v35  ;;  %v2787_v35 = vld [vmem:[%s3261_s21 + $0x148] ss:$48 sps:$4 sm:$0xff]  }
 0x10a   : > { %v2604_v36 = vpack.c.bf16 %v2707_v31, %v2706_v32  ;;  %v2781_v31 = vld [vmem:[%s3261_s21 + $0xe8] ss:$48 sps:$4 sm:$0xff]   ;;  %v2786_v32 = vld [vmem:[%s3261_s21 + $0x144] ss:$48 sps:$4 sm:$0xff]  }
 0x10b   : > { %v2610_v40 = vpack.c.bf16 %v2717_v38, %v2716_v39  ;;  %v2792_v38 = vld [vmem:[#allocation6] sm:$0xff]  }
 0x10c   : > { %2605 = vmatpush3.bf16.msra.mxu1 %v2604_v36  ;;  %v2790_v36 = vld [vmem:[#allocation6 + $0x40] sm:$0xff]  }
 0x10d   : > { %2606 = vmatprep.subr.bf16.mxu1 %v3060_v0  ;;  %v2793_v39 = vld [vmem:[#allocation6 + $0x80] sm:$0xff]  }
 0x110   : > { %2608 = vmatpush3.bf16.msra.mxu1 %v2607_v37  ;;  %v2791_v37 = vld [vmem:[#allocation6 + $0xc0] sm:$0xff]  }
 0x111   : > { %2609 = vmatprep.subr.bf16.mxu1 %v3060_v0  ;;  %v638_v0 = vrot.slane %v3303_v45, %v637_v63  ;;  %v2815_v63 = vld [vmem:[#allocation6 + $0xf0] sm:$0xff]  }
 0x114   : > { %2611 = vmatpush3.bf16.msra.mxu1 %v2610_v40  ;;  %v2794_v40 = vld [vmem:[#allocation6 + $0x48] sm:$0xff]  }
 0x115   : > { %1078 = vmatprep.subr.bf16.mxu1 %v2723_v41  ;;  %v2795_v41 = vld [vmem:[#allocation6 + $0xc8] sm:$0xff]  }
 0x173   : > { %v630_v47 = vpop.f32.mrb[0].mxu0 }
 0x174   : > { %v631_v48 = vadd.f32 %v630_v47, %v559_v46  ;;  %v2568_v49 = vpop.f32.mrb[1].mxu0  ;;  %v2798_v46 = vld [vmem:[#allocation6 + $0x50] sm:$0xff]  }
 0x175   : > { %v2799_v47 = vld [vmem:[#allocation6 + $0xd0] sm:$0xff]  }
 0x176   : > { %v634_v51 = vmax.f32 %v631_v48, 0.0  ;;  %v2800_v48 = vld [vmem:[#allocation6 + $0x10] sm:$0xff]  }
 0x177   : > { %v2801_v49 = vld [vmem:[#allocation6 + $0x90] sm:$0xff]  }
 0x178   : > { %2586 = vmatmul.mubr.msk.f32.vlgmr.msra.gmra.mrb[0].mxu1 %vm560_vm1, %v634_v51  ;;  %v2803_v51 = vld [vmem:[#allocation6 + $0xd8] sm:$0xff]  }
 0x179   : > { %1079 = vmatpush1.bf16.msra.mxu1 %v2721_v50  ;;  %1110 = vmatprep.mubr.bf16.mxu1 %v3064_v62  ;;  %v2802_v50 = vld [vmem:[#allocation6 + $0x58] sm:$0xff]  }
 0x17a   : > { %1080 = vmatprep.subr.bf16.mxu1 %v2729_v52  ;;  %v2804_v52 = vld [vmem:[#allocation6 + $0x18] sm:$0xff]  }
 0x17d   : > { %1081 = vmatpush1.bf16.msra.mxu1 %v2727_v53  ;;  %v2805_v53 = vld [vmem:[#allocation6 + $0x98] sm:$0xff]  }
 0x17e   : > { %1082 = vmatprep.subr.bf16.mxu1 %v2735_v54  ;;  %v2806_v54 = vld [vmem:[#allocation6 + $0x60] sm:$0xff]  }
 0x181   : > { %1083 = vmatpush1.bf16.msra.mxu1 %v2733_v55  ;;  %v2807_v55 = vld [vmem:[#allocation6 + $0xe0] sm:$0xff]  }
 0x182   : > { %1084 = vmatprep.subr.bf16.mxu1 %v2741_v57  ;;  %v2809_v57 = vld [vmem:[#allocation6 + $0xa0] sm:$0xff]  }
 0x185   : > { %1085 = vmatpush1.bf16.msra.mxu1 %v2739_v59  ;;  %v2811_v59 = vld [vmem:[#allocation6 + $0xe8] sm:$0xff]  }
 0x186   : > { %1160 = vmatprep.subr.bf16.mxu1 %v2747_v61  ;;  %v2813_v61 = vld [vmem:[#allocation6 + $0xa8] sm:$0xff]  }
 0x24b   : > { %v740_v1 = vpop.f32.mrb[0].mxu1 }
 0x24c   : > { %v741_v2 = vadd.f32 %v740_v1, %v638_v0  ;;  %v2587_v3 = vpop.f32.mrb[1].mxu1  ;;  %v2816_v0 = vld [vmem:[#allocation6 + $0x30] sm:$0xff]  }
 0x24d   : > { %v2817_v1 = vld [vmem:[#allocation6 + $0xb0] sm:$0xff]   ;;  %v2819_v3 = vld [vmem:[#allocation6 + $0xf8] sm:$0xff]  }
 0x24e   : > { %v744_v4 = vmax.f32 %v741_v2, 0.0  ;;  %v2818_v2 = vld [vmem:[#allocation6 + $0x78] sm:$0xff]  }
 0x250   : > { %v3322_v7 = vpack.c.bf16 %v744_v4, %v744_v4  ;;  %v2820_v4 = vld [vmem:[#allocation6 + $0x38] sm:$0xff]  }
 0x252   : > { %2295 = vmatmul.mubr.msk.bf16.vlgmr.msra.gmra.mrb[4].mxu0 %vm560_vm1, %v3322_v7  ;;  %2296 = vmatmul.mubr.msk.bf16.vlgmr.msra.gmra.mrb[4].mxu1 %vm560_vm1, %v3322_v7 }
 0x253   : > { %1120 = vmatpush1.bf16.msra.mxu0 %v2742_v5  ;;  %1161 = vmatpush1.bf16.msra.mxu1 %v2745_v6  ;;  %v2821_v5 = vld [vmem:[#allocation6 + $0xb8] sm:$0xff]   ;;  %v2822_v6 = vld [vmem:[#allocation6 + $0x140] sm:$0xff]  }
 0x254   : > { %1121 = vmatprep.subr.bf16.mxu0 %v2750_v8  ;;  %1162 = vmatprep.subr.bf16.mxu1 %v2753_v9  ;;  %v3365_v8 = vsub.s32 2, %v3297_v43  ;;  %v546_v9 = vld [vmem:[%s3300_s17 + $0x10] sm:$0xff] }
 0x255   : > { %1151 = vmatprep.mubr.bf16.mxu0 %v3064_v62  ;;  %1192 = vmatprep.mubr.bf16.mxu1 %v3064_v62 }
 0x257   : > { %1122 = vmatpush1.bf16.msra.mxu0 %v2748_v10  ;;  %1163 = vmatpush1.bf16.msra.mxu1 %v2751_v11  ;;  %v545_v10 = vld [vmem:[%s3300_s17 + $0x8] sm:$0xff]  ;;  %v547_v11 = vld [vmem:[%s3300_s17 + $0x18] sm:$0xff] }
 0x258   : > { %1123 = vmatprep.subr.bf16.mxu0 %v2756_v12  ;;  %1164 = vmatprep.subr.bf16.mxu1 %v2759_v13  ;;  %v749_v12 = vrot.slane %v3303_v45, %v3365_v8  ;;  %v757_v13 = vrot.slane %v546_v9, %v3365_v8  ;;  %v2840_v9 = vld [vmem:[#allocation6 + $0x120] sm:$0xff]  }
 0x25b   : > { %1124 = vmatpush1.bf16.msra.mxu0 %v2754_v14  ;;  %1165 = vmatpush1.bf16.msra.mxu1 %v2757_v15  ;;  %v753_v14 = vrot.slane %v545_v10, %v3365_v8  ;;  %v761_v15 = vrot.slane %v547_v11, %v3365_v8  ;;  %v2841_v10 = vld [vmem:[#allocation6 + $0x1a0] sm:$0xff]   ;;  %v2842_v11 = vld [vmem:[#allocation6 + $0x168] sm:$0xff]  }
 0x25c   : > { %1125 = vmatprep.subr.bf16.mxu0 %v2762_v16  ;;  %1166 = vmatprep.subr.bf16.mxu1 %v2765_v17 }
 0x25f   : > { %1126 = vmatpush1.bf16.msra.mxu0 %v2760_v18  ;;  %1167 = vmatpush1.bf16.msra.mxu1 %v2763_v19 }
 0x260   : > { %1201 = vmatprep.subr.bf16.mxu0 %v2768_v20  ;;  %1242 = vmatprep.subr.bf16.mxu1 %v2771_v21 }
 0x262   : > { %2297 = vmatmul.mubr.msk.bf16.vlgmr.msra.gmra.mrb[8].mxu0 %vm560_vm1, %v3322_v7  ;;  %2298 = vmatmul.mubr.msk.bf16.vlgmr.msra.gmra.mrb[8].mxu1 %vm560_vm1, %v3322_v7 }
 0x263   : > { %1202 = vmatpush1.bf16.msra.mxu0 %v2766_v22  ;;  %1243 = vmatpush1.bf16.msra.mxu1 %v2769_v23 }
 0x264   : > { %1203 = vmatprep.subr.bf16.mxu0 %v2774_v24  ;;  %1244 = vmatprep.subr.bf16.mxu1 %v2777_v25 }
 0x265   : > { %1233 = vmatprep.mubr.bf16.mxu0 %v3064_v62  ;;  %1274 = vmatprep.mubr.bf16.mxu1 %v3064_v62  ;;  %v2814_v62 = vld [vmem:[#allocation6 + $0x70] sm:$0xff]  }
 0x267   : > { %1204 = vmatpush1.bf16.msra.mxu0 %v2772_v26  ;;  %1245 = vmatpush1.bf16.msra.mxu1 %v2775_v27 }
 0x268   : > { %1205 = vmatprep.subr.bf16.mxu0 %v2780_v28  ;;  %1246 = vmatprep.subr.bf16.mxu1 %v2783_v29 }
 0x26b   : > { %1206 = vmatpush1.bf16.msra.mxu0 %v2778_v30  ;;  %1247 = vmatpush1.bf16.msra.mxu1 %v2781_v31 }
 0x26c   : > { %1207 = vmatprep.subr.bf16.mxu0 %v2786_v32  ;;  %1248 = vmatprep.subr.bf16.mxu1 %v2789_v33 }
 0x26f   : > { %1208 = vmatpush1.bf16.msra.mxu0 %v2784_v34  ;;  %1249 = vmatpush1.bf16.msra.mxu1 %v2787_v35  ;;  %v2824_v34 = vld [vmem:[#allocation6 + $0x100] sm:$0xff]  }
 0x270   : > { %2418 = vmatprep.subr.bf16.mxu0 %v2790_v36  ;;  %2440 = vmatprep.subr.bf16.mxu1 %v2791_v37  ;;  %v2825_v35 = vld [vmem:[#allocation6 + $0x180] sm:$0xff]  }
 0x272   : > { %2299 = vmatmul.mubr.msk.bf16.vlgmr.msra.gmra.mrb[12].mxu0 %vm560_vm1, %v3322_v7  ;;  %2300 = vmatmul.mubr.msk.bf16.vlgmr.msra.gmra.mrb[12].mxu1 %vm560_vm1, %v3322_v7  ;;  %v2823_v7 = vld [vmem:[#allocation6 + $0x1c0] sm:$0xff]  }
 0x273   : > { %2419 = vmatpush3.bf16.msra.mxu0 %v2792_v38  ;;  %2441 = vmatpush3.bf16.msra.mxu1 %v2793_v39  ;;  %v2826_v38 = vld [vmem:[#allocation6 + $0x148] sm:$0xff]  }
 0x274   : > { %2420 = vmatprep.subr.bf16.mxu0 %v2794_v40  ;;  %2442 = vmatprep.subr.bf16.mxu1 %v2795_v41  ;;  %v2827_v39 = vld [vmem:[#allocation6 + $0x1c8] sm:$0xff]  }
 0x275   : > { %v2828_v40 = vld [vmem:[#allocation6 + $0x108] sm:$0xff]  }
 0x276   : > { %v2829_v41 = vld [vmem:[#allocation6 + $0x188] sm:$0xff]  }
 0x277   : > { %2421 = vmatpush3.bf16.msra.mxu0 %v2796_v42  ;;  %2443 = vmatpush3.bf16.msra.mxu1 %v2797_v44  ;;  %v549_v42 = vld [vmem:[%s3300_s17 + $0x28] sm:$0xff]  ;;  %v551_v44 = vld [vmem:[%s3300_s17 + $0x38] sm:$0xff] }
 0x278   : > { %2422 = vmatprep.subr.bf16.mxu0 %v2798_v46  ;;  %2444 = vmatprep.subr.bf16.mxu1 %v2799_v47  ;;  %v2830_v46 = vld [vmem:[#allocation6 + $0x150] sm:$0xff]  }
 0x279   : > { %v2831_v47 = vld [vmem:[#allocation6 + $0x1d0] sm:$0xff]  }
 0x27b   : > { %2423 = vmatpush3.bf16.msra.mxu0 %v2800_v48  ;;  %2445 = vmatpush3.bf16.msra.mxu1 %v2801_v49  ;;  %v769_v48 = vrot.slane %v549_v42, %v3365_v8  ;;  %v777_v49 = vrot.slane %v551_v44, %v3365_v8 }
 0x27c   : > { %2424 = vmatprep.subr.bf16.mxu0 %v2802_v50  ;;  %2446 = vmatprep.subr.bf16.mxu1 %v2803_v51  ;;  %v2832_v50 = vld [vmem:[#allocation6 + $0x110] sm:$0xff]  }
 0x27d   : > { %v2833_v51 = vld [vmem:[#allocation6 + $0x190] sm:$0xff]  }
 0x27f   : > { %2425 = vmatpush3.bf16.msra.mxu0 %v2804_v52  ;;  %2447 = vmatpush3.bf16.msra.mxu1 %v2805_v53  ;;  %v2834_v52 = vld [vmem:[#allocation6 + $0x158] sm:$0xff]  }
 0x280   : > { %2426 = vmatprep.subr.bf16.mxu0 %v2806_v54  ;;  %2448 = vmatprep.subr.bf16.mxu1 %v2807_v55  ;;  %v2835_v53 = vld [vmem:[#allocation6 + $0x1d8] sm:$0xff]  }
 0x283   : > { %2427 = vmatpush3.bf16.msra.mxu0 %v2808_v56  ;;  %2449 = vmatpush3.bf16.msra.mxu1 %v2809_v57 }
 0x284   : > { %2428 = vmatprep.subr.bf16.mxu0 %v2810_v58  ;;  %2450 = vmatprep.subr.bf16.mxu1 %v2811_v59 }
 0x287   : > { %2429 = vmatpush3.bf16.msra.mxu0 %v2812_v60  ;;  %2451 = vmatpush3.bf16.msra.mxu1 %v2813_v61 }
 0x288   : > { %2430 = vmatprep.subr.bf16.mxu0 %v2814_v62  ;;  %2452 = vmatprep.subr.bf16.mxu1 %v2815_v63  ;;  %v2836_v62 = vld [vmem:[#allocation6 + $0x118] sm:$0xff]  }
 0x289   : > { %v2837_v63 = vld [vmem:[#allocation6 + $0x198] sm:$0xff]  }
 0x28b   : > { %2431 = vmatpush3.bf16.msra.mxu0 %v2816_v0  ;;  %2453 = vmatpush3.bf16.msra.mxu1 %v2817_v1 }
 0x28c   : > { %2432 = vmatprep.subr.bf16.mxu0 %v2818_v2  ;;  %2454 = vmatprep.subr.bf16.mxu1 %v2819_v3  ;;  %v2838_v2 = vld [vmem:[#allocation6 + $0x160] sm:$0xff]  }
 0x28d   : > { %v2839_v3 = vld [vmem:[#allocation6 + $0x1e0] sm:$0xff]  }
 0x28f   : > { %2433 = vmatpush3.bf16.msra.mxu0 %v2820_v4  ;;  %2455 = vmatpush3.bf16.msra.mxu1 %v2821_v5 }
 0x290   : > { %2462 = vmatprep.subr.bf16.mxu0 %v2822_v6  ;;  %2484 = vmatprep.subr.bf16.mxu1 %v2823_v7 }
 0x325   : > { %v1071_v16 = vpop.f32.mrb[4].mxu0  ;;  %v1112_v17 = vpop.f32.mrb[4].mxu1 }
 0x326   : > { %v1072_v18 = vadd.f32 %v1071_v16, %v749_v12  ;;  %v1113_v19 = vadd.f32 %v1112_v17, %v757_v13  ;;  %v1073_v20 = vpop.f32.mrb[5].mxu0  ;;  %v1114_v21 = vpop.f32.mrb[5].mxu1  ;;  %v2843_v12 = vld [vmem:[#allocation6 + $0x1e8] sm:$0xff]   ;;  %v548_v13 = vld [vmem:[%s3300_s17 + $0x20] sm:$0xff] }
 0x327   : > { %v1074_v22 = vadd.f32 %v1073_v20, %v753_v14  ;;  %v1115_v23 = vadd.f32 %v1114_v21, %v761_v15  ;;  %v1075_v24 = vpop.f32.mrb[6].mxu0  ;;  %v1116_v25 = vpop.f32.mrb[6].mxu1  ;;  %v550_v14 = vld [vmem:[%s3300_s17 + $0x30] sm:$0xff]  ;;  %v2844_v15 = vld [vmem:[#allocation6 + $0x128] sm:$0xff]   ;;  %v555_v20 = vld [vmem:[%s3300_s17 + $0x58] sm:$0xff] }
 0x328   : > { %v1283_v26 = vmax.f32 %v1072_v18, 0.0  ;;  %v1285_v27 = vmax.f32 %v1113_v19, 0.0  ;;  %v1076_v28 = vpop.f32.mrb[7].mxu0  ;;  %v1117_v29 = vpop.f32.mrb[7].mxu1  ;;  %v2845_v16 = vld [vmem:[#allocation6 + $0x1a8] sm:$0xff]   ;;  %v765_v18 = vrot.slane %v548_v13, %v3365_v8  ;;  %v773_v19 = vrot.slane %v550_v14, %v3365_v8  ;;  %v2846_v21 = vld [vmem:[#allocation6 + $0x170] sm:$0xff]  }
 0x329   : > { %v1284_v30 = vmax.f32 %v1074_v22, 0.0  ;;  %v1286_v31 = vmax.f32 %v1115_v23, 0.0  ;;  %v553_v17 = vld [vmem:[%s3300_s17 + $0x48] sm:$0xff]  ;;  %v2847_v22 = vld [vmem:[#allocation6 + $0x1f0] sm:$0xff]   ;;  %v793_v24 = vrot.slane %v555_v20, %v3365_v8  ;;  %v2850_v29 = vld [vmem:[#allocation6 + $0x178] sm:$0xff]  }
 0x32a   : > { %v1295_v36 = vpack.c.bf16 %v1283_v26, %v1283_v26  ;;  %v1297_v37 = vpack.c.bf16 %v1285_v27, %v1285_v27  ;;  %v785_v23 = vrot.slane %v553_v17, %v3365_v8  ;;  %v2848_v25 = vld [vmem:[#allocation6 + $0x130] sm:$0xff]   ;;  %v2876_v14 = vld [vmem:[#allocation6 + $0x228] sm:$0xff]  }
 0x32b   : > { %v1296_v32 = vpack.c.bf16 %v1284_v30, %v1284_v30  ;;  %v1298_v33 = vpack.c.bf16 %v1286_v31, %v1286_v31  ;;  %v2849_v26 = vld [vmem:[#allocation6 + $0x1b0] sm:$0xff]   ;;  %v2851_v30 = vld [vmem:[#allocation6 + $0x1f8] sm:$0xff]  }
 0x32c   : > { %v554_v13 = vld [vmem:[%s3300_s17 + $0x50] sm:$0xff] }
 0x32d   : > { %1919 = vmatprep.mubr.bf16.mxu0 %v1296_v32  ;;  %1959 = vmatprep.mubr.bf16.mxu1 %v1298_v33  ;;  %v2878_v17 = vld [vmem:[#allocation6 + $0x270] sm:$0xff]  }
 0x32e   : > { %1920 = vmatmul.mubr.bf16.vlgmr.msra.gmra.mrb[16].mxu0 %v1295_v36  ;;  %1960 = vmatmul.mubr.bf16.vlgmr.msra.gmra.mrb[16].mxu1 %v1297_v37  ;;  %v2880_v20 = vld [vmem:[#allocation6 + $0x230] sm:$0xff]  }
 0x32f   : > { %2463 = vmatpush3.bf16.msra.mxu0 %v2824_v34  ;;  %2485 = vmatpush3.bf16.msra.mxu1 %v2825_v35 }
 0x330   : > { %2464 = vmatprep.subr.bf16.mxu0 %v2826_v38  ;;  %2486 = vmatprep.subr.bf16.mxu1 %v2827_v39  ;;  %v2852_v39 = vld [vmem:[#allocation6 + $0x138] sm:$0xff]  }
 0x333   : > { %2465 = vmatpush3.bf16.msra.mxu0 %v2828_v40  ;;  %2487 = vmatpush3.bf16.msra.mxu1 %v2829_v41  ;;  %v2853_v40 = vld [vmem:[#allocation6 + $0x1b8] sm:$0xff]  }
 0x334   : > { %2466 = vmatprep.subr.bf16.mxu0 %v2830_v46  ;;  %2488 = vmatprep.subr.bf16.mxu1 %v2831_v47  ;;  %v2854_v47 = vld [vmem:[#allocation6 + $0x240] sm:$0xff]  }
 0x335   : > { %v1153_v54 = vpop.f32.mrb[8].mxu0  ;;  %v1194_v55 = vpop.f32.mrb[8].mxu1 }
 0x336   : > { %v1155_v56 = vpop.f32.mrb[9].mxu0  ;;  %v1196_v57 = vpop.f32.mrb[9].mxu1  ;;  %v1154_v27 = vadd.f32 %v1153_v54, %v765_v18  ;;  %v1195_v28 = vadd.f32 %v1194_v55, %v773_v19  ;;  %v2857_v54 = vld [vmem:[#allocation6 + $0x280] sm:$0xff]   ;;  %v789_v18 = vrot.slane %v554_v13, %v3365_v8  ;;  %v2879_v19 = vld [vmem:[#allocation6 + $0x2f0] sm:$0xff]  }
 0x337   : > { %v1156_v58 = vadd.f32 %v1155_v56, %v769_v48  ;;  %v1197_v59 = vadd.f32 %v1196_v57, %v777_v49  ;;  %v1157_v60 = vpop.f32.mrb[10].mxu0  ;;  %v1198_v61 = vpop.f32.mrb[10].mxu1  ;;  %2467 = vmatpush3.bf16.msra.mxu0 %v2832_v50  ;;  %2489 = vmatpush3.bf16.msra.mxu1 %v2833_v51  ;;  %v2855_v48 = vld [vmem:[#allocation6 + $0x2c0] sm:$0xff]   ;;  %v2858_v56 = vld [vmem:[#allocation6 + $0x248] sm:$0xff]  }
 0x338   : > { %v1158_v0 = vpop.f32.mrb[11].mxu0  ;;  %v1199_v1 = vpop.f32.mrb[11].mxu1  ;;  %2468 = vmatprep.subr.bf16.mxu0 %v2834_v52  ;;  %2490 = vmatprep.subr.bf16.mxu1 %v2835_v53  ;;  %v1287_v41 = vmax.f32 %v1154_v27, 0.0  ;;  %v1289_v42 = vmax.f32 %v1195_v28, 0.0  ;;  %v2856_v51 = vld [vmem:[#allocation6 + $0x200] sm:$0xff]   ;;  %v2859_v57 = vld [vmem:[#allocation6 + $0x2c8] sm:$0xff]  }
 0x339   : > { %v1288_v4 = vmax.f32 %v1156_v58, 0.0  ;;  %v1290_v5 = vmax.f32 %v1197_v59, 0.0  ;;  %v2860_v59 = vld [vmem:[#allocation6 + $0x208] sm:$0xff]   ;;  %v2862_v61 = vld [vmem:[#allocation6 + $0x250] sm:$0xff]   ;;  %v2866_v1 = vld [vmem:[#allocation6 + $0x258] sm:$0xff]  }
 0x33a   : > { %v1299_v52 = vpack.c.bf16 %v1287_v41, %v1287_v41  ;;  %v1301_v53 = vpack.c.bf16 %v1289_v42, %v1289_v42  ;;  %v2861_v60 = vld [vmem:[#allocation6 + $0x288] sm:$0xff]   ;;  %v2865_v0 = vld [vmem:[#allocation6 + $0x290] sm:$0xff]  }
 0x33b   : > { %v1300_v6 = vpack.c.bf16 %v1288_v4, %v1288_v4  ;;  %v1302_v7 = vpack.c.bf16 %v1290_v5, %v1290_v5  ;;  %2469 = vmatpush3.bf16.msra.mxu0 %v2836_v62  ;;  %2491 = vmatpush3.bf16.msra.mxu1 %v2837_v63  ;;  %v2863_v62 = vld [vmem:[#allocation6 + $0x2d0] sm:$0xff]   ;;  %v2869_v4 = vld [vmem:[#allocation6 + $0x298] sm:$0xff]   ;;  %v2870_v5 = vld [vmem:[#allocation6 + $0x260] sm:$0xff]  }
 0x33c   : > { %2470 = vmatprep.subr.bf16.mxu0 %v2838_v2  ;;  %2492 = vmatprep.subr.bf16.mxu1 %v2839_v3  ;;  %v2864_v63 = vld [vmem:[#allocation6 + $0x210] sm:$0xff]   ;;  %v2867_v2 = vld [vmem:[#allocation6 + $0x2d8] sm:$0xff]  }
 0x33d   : > { %1999 = vmatprep.mubr.bf16.mxu0 %v1300_v6  ;;  %2039 = vmatprep.mubr.bf16.mxu1 %v1302_v7  ;;  %v2868_v3 = vld [vmem:[#allocation6 + $0x218] sm:$0xff]   ;;  %v2871_v6 = vld [vmem:[#allocation6 + $0x2e0] sm:$0xff]  }
 0x33e   : > { %v2872_v7 = vld [vmem:[#allocation6 + $0x220] sm:$0xff]  }
 0x33f   : > { %2471 = vmatpush3.bf16.msra.mxu0 %v2840_v9  ;;  %2493 = vmatpush3.bf16.msra.mxu1 %v2841_v10  ;;  %v2873_v9 = vld [vmem:[#allocation6 + $0x2a0] sm:$0xff]   ;;  %v2874_v10 = vld [vmem:[#allocation6 + $0x268] sm:$0xff]  }
 0x340   : > { %2472 = vmatprep.subr.bf16.mxu0 %v2842_v11  ;;  %2494 = vmatprep.subr.bf16.mxu1 %v2843_v12  ;;  %v552_v11 = vld [vmem:[%s3300_s17 + $0x40] sm:$0xff]  ;;  %v2875_v12 = vld [vmem:[#allocation6 + $0x2e8] sm:$0xff]  }
 0x343   : > { %2473 = vmatpush3.bf16.msra.mxu0 %v2844_v15  ;;  %2495 = vmatpush3.bf16.msra.mxu1 %v2845_v16  ;;  %v781_v15 = vrot.slane %v552_v11, %v3365_v8  ;;  %v2877_v16 = vld [vmem:[#allocation6 + $0x2a8] sm:$0xff]   ;;  %v2885_v8 = vld [vmem:[#allocation6 + $0x2b8] sm:$0xff]  }
 0x344   : > { %2474 = vmatprep.subr.bf16.mxu0 %v2846_v21  ;;  %2496 = vmatprep.subr.bf16.mxu1 %v2847_v22  ;;  %v2881_v22 = vld [vmem:[#allocation6 + $0x2b0] sm:$0xff]  }
 0x345   : > { %v3387_v31 = vpop.f32.mrb[12].mxu0  ;;  %v3389_v32 = vpop.f32.mrb[12].mxu1 }
 0x346   : > { %v1237_v33 = vpop.f32.mrb[13].mxu0  ;;  %v1278_v34 = vpop.f32.mrb[13].mxu1  ;;  %v1236_v21 = vadd.f32 %v3387_v31, %v781_v15  ;;  %v1309_v31 = vsub.s32 3, %v3297_v43 }
 0x347   : > { %v1238_v35 = vadd.f32 %v1237_v33, %v785_v23  ;;  %v1279_v36 = vadd.f32 %v1278_v34, %v793_v24  ;;  %v1239_v37 = vpop.f32.mrb[14].mxu0  ;;  %v1280_v38 = vpop.f32.mrb[14].mxu1  ;;  %2475 = vmatpush3.bf16.msra.mxu0 %v2848_v25  ;;  %2497 = vmatpush3.bf16.msra.mxu1 %v2849_v26  ;;  %v2882_v23 = vld [vmem:[#allocation6 + $0x278] sm:$0xff]   ;;  %v1277_v24 = vadd.f32 %v3389_v32, %v789_v18 }
 0x348   : > { %v1240_v44 = vpop.f32.mrb[15].mxu0  ;;  %v1281_v46 = vpop.f32.mrb[15].mxu1  ;;  %2476 = vmatprep.subr.bf16.mxu0 %v2850_v29  ;;  %2498 = vmatprep.subr.bf16.mxu1 %v2851_v30  ;;  %v2883_v25 = vld [vmem:[#allocation6 + $0x2f8] sm:$0xff]   ;;  %v1291_v27 = vmax.f32 %v1236_v21, 0.0  ;;  %v1310_v34 = vrot.slane %v3303_v45, %v1309_v31 }
 0x349   : > { %v1292_v49 = vmax.f32 %v1238_v35, 0.0  ;;  %v1294_v50 = vmax.f32 %v1279_v36, 0.0  ;;  %v2884_v26 = vld [vmem:[#allocation6 + $0x238] sm:$0xff]   ;;  %v1293_v28 = vmax.f32 %v1277_v24, 0.0 }
 0x34a   : > { %v1303_v29 = vpack.c.bf16 %v1291_v27, %v1291_v27 }
 0x34b   : > { %2477 = vmatpush3.bf16.msra.mxu0 %v2852_v39  ;;  %2499 = vmatpush3.bf16.msra.mxu1 %v2853_v40  ;;  %v1304_v55 = vpack.c.bf16 %v1292_v49, %v1292_v49  ;;  %v1306_v58 = vpack.c.bf16 %v1294_v50, %v1294_v50  ;;  %v1305_v30 = vpack.c.bf16 %v1293_v28, %v1293_v28 }
 0x34c   : > { %2506 = vmatprep.subr.bf16.mxu0 %v2854_v47  ;;  %2528 = vmatprep.subr.bf16.mxu1 %v2855_v48 }
 0x34e   : > { %2000 = vmatmul.mubr.bf16.vlgmr.msra.gmra.mrb[20].mxu0 %v1299_v52  ;;  %2040 = vmatmul.mubr.bf16.vlgmr.msra.gmra.mrb[20].mxu1 %v1301_v53 }
 0x34f   : > { %2507 = vmatpush3.bf16.msra.mxu0 %v2856_v51  ;;  %2079 = vmatprep.mubr.bf16.mxu0 %v1304_v55 }
 0x350   : > { %2529 = vmatpush3.bf16.msra.mxu1 %v2857_v54  ;;  %2119 = vmatprep.mubr.bf16.mxu1 %v1306_v58 }
 0x351   : > { %2508 = vmatprep.subr.bf16.mxu0 %v2858_v56  ;;  %2530 = vmatprep.subr.bf16.mxu1 %v2859_v57 }
 0x353   : > { %2509 = vmatpush3.bf16.msra.mxu0 %v2860_v59 }
 0x354   : > { %2531 = vmatpush3.bf16.msra.mxu1 %v2861_v60  ;;  %2510 = vmatprep.subr.bf16.mxu0 %v2862_v61 }
 0x355   : > { %2532 = vmatprep.subr.bf16.mxu1 %v2863_v62 }
 0x357   : > { %2511 = vmatpush3.bf16.msra.mxu0 %v2864_v63 }
 0x358   : > { %2533 = vmatpush3.bf16.msra.mxu1 %v2865_v0  ;;  %2512 = vmatprep.subr.bf16.mxu0 %v2866_v1 }
 0x359   : > { %2534 = vmatprep.subr.bf16.mxu1 %v2867_v2 }
 0x35b   : > { %2513 = vmatpush3.bf16.msra.mxu0 %v2868_v3 }
 0x35c   : > { %2535 = vmatpush3.bf16.msra.mxu1 %v2869_v4  ;;  %2514 = vmatprep.subr.bf16.mxu0 %v2870_v5 }
 0x35d   : > { %2536 = vmatprep.subr.bf16.mxu1 %v2871_v6 }
 0x35f   : > { %2515 = vmatpush3.bf16.msra.mxu0 %v2872_v7 }
 0x360   : > { %2537 = vmatpush3.bf16.msra.mxu1 %v2873_v9  ;;  %2516 = vmatprep.subr.bf16.mxu0 %v2874_v10 }
 0x361   : > { %2538 = vmatprep.subr.bf16.mxu1 %v2875_v12 }
 0x363   : > { %2517 = vmatpush3.bf16.msra.mxu0 %v2876_v14 }
 0x364   : > { %2539 = vmatpush3.bf16.msra.mxu1 %v2877_v16  ;;  %2518 = vmatprep.subr.bf16.mxu0 %v2878_v17 }
 0x365   : > { %2540 = vmatprep.subr.bf16.mxu1 %v2879_v19 }
 0x367   : > { %2519 = vmatpush3.bf16.msra.mxu0 %v2880_v20 }
 0x368   : > { %2541 = vmatpush3.bf16.msra.mxu1 %v2881_v22  ;;  %2520 = vmatprep.subr.bf16.mxu0 %v2882_v23 }
 0x369   : > { %2542 = vmatprep.subr.bf16.mxu1 %v2883_v25 }
 0x36b   : > { %2521 = vmatpush3.bf16.msra.mxu0 %v2884_v26 }
 0x36c   : > { %2543 = vmatpush3.bf16.msra.mxu1 %v2885_v8 }
 0x36e   : > { %2080 = vmatmul.mubr.bf16.vlgmr.msra.gmra.mrb[24].mxu0 %v1303_v29 }
 0x36f   : > { %2120 = vmatmul.mubr.bf16.vlgmr.msra.gmra.mrb[24].mxu1 %v1305_v30 }
 0x401   : > { %v2434_v33 = vpop.f32.mrb[16].mxu0  ;;  %v2456_v32 = vpop.f32.mrb[16].mxu1 }
 0x402   : > { %v2435_v35 = vpop.f32.mrb[17].mxu0  ;;  %v2457_v36 = vpop.f32.mrb[17].mxu1 }
 0x403   : > { %v2436_v37 = vadd.f32 %v2435_v35, %v2434_v33  ;;  %v2458_v38 = vadd.f32 %v2457_v36, %v2456_v32  ;;  %v2437_v39 = vpop.f32.mrb[18].mxu0  ;;  %v2459_v40 = vpop.f32.mrb[18].mxu1 }
 0x404   : > { %v2438_v41 = vpop.f32.mrb[19].mxu0  ;;  %v2460_v42 = vpop.f32.mrb[19].mxu1 }
 0x405   : > { %v1922_v44 = vadd.f32 %v2436_v37, %v1310_v34 }
 0x407   : > { %v1962_v46 = vadd.f32 %v2458_v38, %v1922_v44 }
 0x421   : > { %v2478_v47 = vpop.f32.mrb[20].mxu0  ;;  %v2500_v48 = vpop.f32.mrb[20].mxu1 }
 0x422   : > { %v2479_v49 = vpop.f32.mrb[21].mxu0  ;;  %v2501_v43 = vpop.f32.mrb[21].mxu1 }
 0x423   : > { %v2480_v50 = vadd.f32 %v2479_v49, %v2478_v47  ;;  %v2502_v51 = vadd.f32 %v2501_v43, %v2500_v48  ;;  %v2481_v52 = vpop.f32.mrb[22].mxu0  ;;  %v2503_v45 = vpop.f32.mrb[22].mxu1 }
 0x424   : > { %v2482_v53 = vpop.f32.mrb[23].mxu0  ;;  %v2504_v54 = vpop.f32.mrb[23].mxu1 }
 0x425   : > { %v2002_v55 = vadd.f32 %v2480_v50, %v1962_v46 }
 0x427   : > { %v2042_v56 = vadd.f32 %v2502_v51, %v2002_v55 }
 0x441   : > { %v2522_v57 = vpop.f32.mrb[24].mxu0 }
 0x442   : > { %v2544_v58 = vpop.f32.mrb[24].mxu1  ;;  %v2523_v59 = vpop.f32.mrb[25].mxu0 }
 0x443   : > { %v2524_v60 = vadd.f32 %v2523_v59, %v2522_v57  ;;  %v2545_v61 = vpop.f32.mrb[25].mxu1  ;;  %v2525_v62 = vpop.f32.mrb[26].mxu0 }
 0x444   : > { %v2546_v63 = vadd.f32 %v2545_v61, %v2544_v58  ;;  %v2547_v0 = vpop.f32.mrb[26].mxu1  ;;  %v2526_v1 = vpop.f32.mrb[27].mxu0 }
 0x445   : > { %v2082_v2 = vadd.f32 %v2524_v60, %v2042_v56  ;;  %v2548_v3 = vpop.f32.mrb[27].mxu1 }
 0x447   : > { %v2122_v4 = vadd.f32 %v2546_v63, %v2082_v2 }
 0x449   : > { %2127 = vst [vmem:[%s286_s24] sm:$0xff] %v2122_v4 }
 0x44a PF: > { %p17_p12 = scmp.ge.s32.totalorder %s3117_s23, 7   ;;  %s3443_s18 = smov %s3038_s19 }
 0x44b   : > { %s3444_s19 = smov %s3042_s20  ;;  %s3445_s20 = smov %s3127_s26 }
 0x44c   : > { %s3446_s21 = smov %s3117_s23  ;;  %19 = sbr.rel (!%p17_p12) target bundleno = 7 (0x7), region = 96 }
 0x453   :  { %2147 = vsyncpa [#allocation3], 1 }
 0x454   :  { %2149 = vsyncpa [#allocation3 + $0x1], 1 }
 0x455   :  { %2150 = vsyncpa [#allocation5], 1 }
 0x456   :  { %2152 = vsyncpa [#allocation5 + $0x1], 1 }
 0x457   :  { %2153 = vsyncpa [#allocation8], 1 }

</bundles_post_ra>
